<compile_context>
chip_gen: v7x
topology: tpu7x:2x2x1
jax: 0.10.0
libtpu: 0.0.40
codegen_flags: <defaults>
</compile_context>

<pallas_src>
import functools

import jax
import jax.numpy as jnp
from jax.experimental import pallas as pl
from jax.experimental.pallas import tpu as pltpu


# ---------------------------------------------------------------------------
# Kernel: o = tanh(x @ W + b), K-tiled with an f32 accumulator.
# ---------------------------------------------------------------------------
def _affine_tanh_kernel(x_ref, w_ref, b_ref, o_ref, acc_ref):
    k = pl.program_id(2)

    @pl.when(k == 0)
    def _():
        acc_ref[...] = jnp.zeros_like(acc_ref)

    acc_ref[...] += jnp.dot(x_ref[...], w_ref[...],
                            preferred_element_type=jnp.float32)

    @pl.when(k == pl.num_programs(2) - 1)
    def _():
        # Epilogue kept in f32 (bias add + tanh), cast only at the store.
        o_ref[...] = jnp.tanh(acc_ref[...] + b_ref[...]).astype(o_ref.dtype)


# ---------------------------------------------------------------------------
# Parameter init (mirrors nn.Linear's U(-1/sqrt(fan_in), 1/sqrt(fan_in)));
# weights stored already transposed as (in, out).
# ---------------------------------------------------------------------------
def init_hash_layer_params(key, feature_in, feature_out, depth,
                           dtype=jnp.float32):
    def linear(k, fin, fout):
        kw, kb = jax.random.split(k)
        bound = 1.0 / (fin ** 0.5)
        w = jax.random.uniform(kw, (fin, fout), dtype, -bound, bound)
        b = jax.random.uniform(kb, (1, fout), dtype, -bound, bound)
        return w, b

    if depth == 1:
        w, b = linear(key, feature_in, feature_out)
        return {"w1": w, "b1": b}
    elif depth == 2:
        k1, k2 = jax.random.split(key)
        w1, b1 = linear(k1, feature_in, 2 * feature_out)
        w2, b2 = linear(k2, 2 * feature_out, feature_out)
        return {"w1": w1, "b1": b1, "w2": w2, "b2": b2}
    raise ValueError("depth must be 1 or 2")


# ---------------------------------------------------------------------------
# Wrapper
# ---------------------------------------------------------------------------
def _round_up(x, m):
    return (x + m - 1) // m * m


def _affine_tanh(x, w, b, compute_dtype):
    """x:(M,K) w:(K,N) b:(1,N) -> tanh(x @ w + b), tiled Pallas call."""
    M, K = x.shape
    N = w.shape[1]
    out_dtype = x.dtype

    # Tile sizes (lane-dense, sublane-aligned) and padded extents.
    TM = min(256, _round_up(M, 8))
    TK = min(512, _round_up(K, 128))
    TN = min(512, _round_up(N, 128))
    M_pad = _round_up(M, TM)
    K_pad = _round_up(K, TK)
    N_pad = _round_up(N, TN)

    if compute_dtype is not None:
        x = x.astype(compute_dtype)
        w = w.astype(compute_dtype)
    b = b.astype(jnp.float32)

    # Zero padding is exact for the matmul; padded output rows/cols sliced off.
    x_p = jnp.pad(x, ((0, M_pad - M), (0, K_pad - K)))
    w_p = jnp.pad(w, ((0, K_pad - K), (0, N_pad - N)))
    b_p = jnp.pad(b, ((0, 0), (0, N_pad - N)))

    grid = (M_pad // TM, N_pad // TN, K_pad // TK)

    cost = pl.CostEstimate(
        flops=2 * M_pad * K_pad * N_pad,
        transcendentals=M_pad * N_pad,
        bytes_accessed=(x_p.size * x_p.dtype.itemsize
                        + w_p.size * w_p.dtype.itemsize
                        + b_p.size * b_p.dtype.itemsize
                        + M_pad * N_pad * jnp.dtype(out_dtype).itemsize),
    )

    out = pl.pallas_call(
        _affine_tanh_kernel,
        out_shape=jax.ShapeDtypeStruct((M_pad, N_pad), out_dtype),
        grid_spec=pltpu.PrefetchScalarGridSpec(
            num_scalar_prefetch=0,
            grid=grid,
            in_specs=[
                pl.BlockSpec((TM, TK), lambda i, j, k: (i, k)),
                pl.BlockSpec((TK, TN), lambda i, j, k: (k, j)),
                pl.BlockSpec((1, TN), lambda i, j, k: (0, j)),
            ],
            out_specs=pl.BlockSpec((TM, TN), lambda i, j, k: (i, j)),
            scratch_shapes=[pltpu.VMEM((TM, TN), jnp.float32)],
        ),
        compiler_params=pltpu.CompilerParams(
            dimension_semantics=("parallel", "parallel", "arbitrary")),
        cost_estimate=cost,
    )(x_p, w_p, b_p)

    return out[:M, :N]


@functools.partial(jax.jit, static_argnames=("depth", "compute_dtype"))
def hash_layer_forward(x, params, depth, compute_dtype=None):
    """x: (batch, feature_in) -> tanh(affine(x)) of shape (batch, feature_out).

    compute_dtype: None (keep input dtype) or jnp.bfloat16 to run the MXU in
    bf16 with f32 accumulation.
    """
    if depth == 1:
        w, b = params["w1"], params["b1"]
    elif depth == 2:
        # No nonlinearity between the two Linears -> fold into one affine map.
        w = params["w1"] @ params["w2"]
        b = params["b1"] @ params["w2"] + params["b2"]
    else:
        raise ValueError("depth must be 1 or 2")
    return _affine_tanh(x, w, b, compute_dtype)


# ---------------------------------------------------------------------------
# Demo / check
# ---------------------------------------------------------------------------
if __name__ == "__main__":
    key = jax.random.PRNGKey(0)
    kx, kp1, kp2 = jax.random.split(key, 3)

    batch, feature_in, feature_out = 8, 32, 16
    x = jax.random.normal(kx, (batch, feature_in), jnp.float32)

    ok = True
    for depth, kp in ((1, kp1), (2, kp2)):
        params = init_hash_layer_params(kp, feature_in, feature_out, depth)

        # Pure-JAX reference, computed exactly as the PyTorch module does
        # (two separate Linears for depth==2 — the kernel folds them).
        ref = x @ params["w1"] + params["b1"]
        if depth == 2:
            ref = ref @ params["w2"] + params["b2"]
        ref = jnp.tanh(ref)

        # f32 path: tight tolerance.
        out = jax.block_until_ready(hash_layer_forward(x, params, depth))
        if out.shape != (batch, feature_out):
            ok = False
        if not jnp.allclose(out, ref, atol=2e-5, rtol=2e-5):
            ok = False

        # bf16 MXU path: looser tolerance (output still in [-1, 1]).
        out_bf16 = jax.block_until_ready(
            hash_layer_forward(x, params, depth, compute_dtype=jnp.bfloat16))
        if out_bf16.shape != (batch, feature_out):
            ok = False
        if not jnp.allclose(out_bf16, ref, atol=3e-2, rtol=3e-2):
            ok = False

    if ok:
        print("KERNEL_OK")
</pallas_src>

<mosaic_0001>
module attributes {stable_mosaic.version = 11 : i64} {
  func.func @_affine_tanh_kernel(%arg0: i32, %arg1: i32, %arg2: i32, %arg3: memref<8x128xf32, #tpu.memory_space<vmem>>, %arg4: memref<128x128xf32, #tpu.memory_space<vmem>>, %arg5: memref<1x128xf32, #tpu.memory_space<vmem>>, %arg6: memref<8x128xf32, #tpu.memory_space<vmem>>, %arg7: memref<8x128xf32, #tpu.memory_space<vmem>>) attributes {dimension_semantics = [#tpu.dimension_semantics<parallel>, #tpu.dimension_semantics<parallel>, #tpu.dimension_semantics<arbitrary>], iteration_bounds = array<i64: 1, 1, 1>, scalar_prefetch = 0 : i64, scratch_operands = 1 : i64, tpu.core_type = #tpu.core_type<tc>, window_params = [{transform_indices = @transform_0, window_bounds = array<i64: 8, 128>}, {transform_indices = @transform_1, window_bounds = array<i64: 128, 128>}, {transform_indices = @transform_2, window_bounds = array<i64: 1, 128>}, {transform_indices = @transform_3, window_bounds = array<i64: 8, 128>}]} {
    %c0_i32 = arith.constant 0 : i32
    %0 = arith.cmpi eq, %arg2, %c0_i32 : i32
    %1 = arith.extui %0 : i1 to i32
    %c0_i32_0 = arith.constant 0 : i32
    %2 = arith.cmpi ne, %1, %c0_i32_0 : i32
    scf.if %2 {
      %cst_10 = arith.constant 0.000000e+00 : f32
      %12 = vector.broadcast %cst_10 : f32 to vector<8x128xf32>
      %c0_11 = arith.constant 0 : index
      %c0_12 = arith.constant 0 : index
      %13 = vector.load %arg7[%c0_11, %c0_12] : memref<8x128xf32, #tpu.memory_space<vmem>>, vector<8x128xf32>
      tpu.vector_store %arg7[%c0_11, %c0_12], %12 {strides = array<i32>} : memref<8x128xf32, #tpu.memory_space<vmem>>, vector<8x128xf32>,
    } else {
    }
    %c0 = arith.constant 0 : index
    %c0_1 = arith.constant 0 : index
    %3 = vector.load %arg7[%c0, %c0_1] : memref<8x128xf32, #tpu.memory_space<vmem>>, vector<8x128xf32>
    %c0_2 = arith.constant 0 : index
    %c0_3 = arith.constant 0 : index
    %4 = vector.load %arg3[%c0_2, %c0_3] : memref<8x128xf32, #tpu.memory_space<vmem>>, vector<8x128xf32>
    %c0_4 = arith.constant 0 : index
    %c0_5 = arith.constant 0 : index
    %5 = vector.load %arg4[%c0_4, %c0_5] : memref<128x128xf32, #tpu.memory_space<vmem>>, vector<128x128xf32>
    %cst = arith.constant dense<0.000000e+00> : vector<8x128xf32>
    %6 = tpu.matmul %4, %5, %cst {dimension_numbers = #tpu.dot_dimension_numbers<[1], [0], [0], [1], [0, 0, 1, 1], [], []>} : vector<8x128xf32>, vector<128x128xf32>, vector<8x128xf32> -> vector<8x128xf32>
    %7 = arith.addf %3, %6 : vector<8x128xf32>
    %c0_6 = arith.constant 0 : index
    %c0_7 = arith.constant 0 : index
    %8 = vector.load %arg7[%c0_6, %c0_7] : memref<8x128xf32, #tpu.memory_space<vmem>>, vector<8x128xf32>
    tpu.vector_store %arg7[%c0_6, %c0_7], %7 {strides = array<i32>} : memref<8x128xf32, #tpu.memory_space<vmem>>, vector<8x128xf32>,
    %c0_i32_8 = arith.constant 0 : i32
    %9 = arith.cmpi eq, %arg2, %c0_i32_8 : i32
    %10 = arith.extui %9 : i1 to i32
    %c0_i32_9 = arith.constant 0 : i32
    %11 = arith.cmpi ne, %10, %c0_i32_9 : i32
    scf.if %11 {
      %c0_10 = arith.constant 0 : index
      %c0_11 = arith.constant 0 : index
      %12 = vector.load %arg7[%c0_10, %c0_11] : memref<8x128xf32, #tpu.memory_space<vmem>>, vector<8x128xf32>
      %c0_12 = arith.constant 0 : index
      %c0_13 = arith.constant 0 : index
      %13 = vector.load %arg5[%c0_12, %c0_13] : memref<1x128xf32, #tpu.memory_space<vmem>>, vector<1x128xf32>
      %14 = vector.broadcast %13 : vector<1x128xf32> to vector<8x128xf32>
      %15 = arith.addf %12, %14 : vector<8x128xf32>
      %16 = math.tanh %15 : vector<8x128xf32>
      %c0_14 = arith.constant 0 : index
      %c0_15 = arith.constant 0 : index
      %17 = vector.load %arg6[%c0_14, %c0_15] : memref<8x128xf32, #tpu.memory_space<vmem>>, vector<8x128xf32>
      tpu.vector_store %arg6[%c0_14, %c0_15], %16 {strides = array<i32>} : memref<8x128xf32, #tpu.memory_space<vmem>>, vector<8x128xf32>,
    } else {
    }
    return
  }
  func.func @transform_0(%arg0: i32, %arg1: i32, %arg2: i32) -> (i32, i32) {
    %c0_i32 = arith.constant 0 : i32
    return %arg0, %arg2 : i32, i32
  }
  func.func @transform_1(%arg0: i32, %arg1: i32, %arg2: i32) -> (i32, i32) {
    %c0_i32 = arith.constant 0 : i32
    return %arg2, %arg1 : i32, i32
  }
  func.func @transform_2(%arg0: i32, %arg1: i32, %arg2: i32) -> (i32, i32) {
    %c0_i32 = arith.constant 0 : i32
    %c0_i32_0 = arith.constant 0 : i32
    return %c0_i32, %arg1 : i32, i32
  }
  func.func @transform_3(%arg0: i32, %arg1: i32, %arg2: i32) -> (i32, i32) {
    %c0_i32 = arith.constant 0 : i32
    return %arg0, %arg1 : i32, i32
  }
}

</mosaic_0001>

<bundles_post_ra>
// kernel: hash_layer_forward.1
= control target key start
LH: loop header
LB: loop body
LE: loop exit
PB: predicated region body
PF: predicated region fallthrough
CT: control target
= control target key end

     0   :  { %v245_v3 = vmov 0.0|0.0   ;;  %vm246_vm0 = vmmov 0   ;;  %v247_v6 = vmov 0.0   ;;  %s335_s0 = inlined_call_operand.vmem [shape: f32[8,128], index: 0, kind: input, shape index: {}]   ;;  %s336_s1 = inlined_call_operand.vmem [shape: f32[128,128], index: 1, kind: input, shape index: {}]   ;;  %s337_s2 = inlined_call_operand.vmem [shape: f32[1,128], index: 2, kind: input, shape index: {}]   ;;  %s338_s3 = inlined_call_operand.hbm [shape: f32[8,128], index: 3, kind: output, shape index: {}]  }
   0x1   :  { %v22_v0 = vld [vmem:[%s336_s1] sm:$0xff]  ;;  %v23_v1 = vld [vmem:[%s336_s1 + $0x8] sm:$0xff]  ;;  %v24_v2 = vld [vmem:[%s336_s1 + $0x10] sm:$0xff]  ;;  %191 = vmatprep.subr.bf16.mxu0 %v245_v3  ;;  %188 = vmatprep.mubr.msk.f32.mxu0 %vm246_vm0, %v247_v6 }
   0x2   :  { %v192_v4 = vpack.c.bf16 %v23_v1, %v22_v0  ;;  %v25_v5 = vld [vmem:[%s336_s1 + $0x18] sm:$0xff]  ;;  %v26_v8 = vld [vmem:[%s336_s1 + $0x20] sm:$0xff]  ;;  %v27_v9 = vld [vmem:[%s336_s1 + $0x28] sm:$0xff] }
   0x3   :  { %v195_v7 = vpack.c.bf16 %v25_v5, %v24_v2 }
   0x4   :  { %193 = vmatpush3.bf16.msra.mxu0 %v192_v4 }
   0x5   :  { %194 = vmatprep.subr.bf16.mxu0 %v245_v3 }
   0x6   :  { %8 = vsyncpa [#allocation4], 0  ;;  %v198_v10 = vpack.c.bf16 %v27_v9, %v26_v8  ;;  %v28_v11 = vld [vmem:[%s336_s1 + $0x30] sm:$0xff]  ;;  %v29_v12 = vld [vmem:[%s336_s1 + $0x38] sm:$0xff]  ;;  %s248_s21 = smov [#allocation3]  }
   0x7   :  { %v201_v13 = vpack.c.bf16 %v29_v12, %v28_v11  ;;  %v30_v14 = vld [vmem:[%s336_s1 + $0x40] sm:$0xff]  ;;  %v31_v15 = vld [vmem:[%s336_s1 + $0x48] sm:$0xff]  ;;  %v32_v17 = vld [vmem:[%s336_s1 + $0x50] sm:$0xff]  ;;  %s130_s22 = sshll.u32 %s248_s21, 4  ;;  %s131_s22 = int_to_ptr.vmem [resolvable:$true] %s130_s22 }
   0x8   :  { %196 = vmatpush3.bf16.msra.mxu0 %v195_v7  ;;  %v204_v16 = vpack.c.bf16 %v31_v15, %v30_v14  ;;  %v33_v18 = vld [vmem:[%s336_s1 + $0x58] sm:$0xff]  ;;  %v34_v20 = vld [vmem:[%s336_s1 + $0x60] sm:$0xff]  ;;  %v35_v21 = vld [vmem:[%s336_s1 + $0x68] sm:$0xff]  ;;  %p226_p1 = scmp.lt.s32.totalorder %s131_s22, %s131_s22 }
   0x9   :  { %197 = vmatprep.subr.bf16.mxu0 %v245_v3  ;;  %v207_v19 = vpack.c.bf16 %v33_v18, %v32_v17  ;;  %v210_v22 = vpack.c.bf16 %v35_v21, %v34_v20  ;;  %v36_v23 = vld [vmem:[%s336_s1 + $0x70] sm:$0xff]  ;;  %v37_v24 = vld [vmem:[%s336_s1 + $0x78] sm:$0xff]  ;;  %v21_v26 = vld [vmem:[%s335_s0] sm:$0xff]  ;;  %s221_s1 = scalar_lea.vmem %s131_s22, 128 }
   0xa   :  { %v213_v25 = vpack.c.bf16 %v37_v24, %v36_v23  ;;  %v138_v27 = vld [vmem:[%s337_s2] ss:$0 sm:$0xff]  ;;  %p222_p0 = scmp.ne.s32.totalorder %s131_s22, %s221_s1  ;;  %p227_p2 = scmp.lt.s32.totalorder %s221_s1, %s221_s1 }
   0xc   :  { %199 = vmatpush3.bf16.msra.mxu0 %v198_v10  ;;  %p228_p3 = por %p227_p2, %p226_p1 }
   0xd   :  { %200 = vmatprep.subr.bf16.mxu0 %v245_v3 }
   0xe   :  { %p229_p4 = pnand %p228_p3, %p222_p0 }
  0x10   :  { %202 = vmatpush3.bf16.msra.mxu0 %v201_v13 }
  0x11   :  { %203 = vmatprep.subr.bf16.mxu0 %v245_v3 }
  0x14   :  { %205 = vmatpush3.bf16.msra.mxu0 %v204_v16 }
  0x15   :  { %206 = vmatprep.subr.bf16.mxu0 %v245_v3 }
  0x18   :  { %208 = vmatpush3.bf16.msra.mxu0 %v207_v19 }
  0x19   :  { %209 = vmatprep.subr.bf16.mxu0 %v245_v3 }
  0x1c   :  { %211 = vmatpush3.bf16.msra.mxu0 %v210_v22 }
  0x1d   :  { %212 = vmatprep.subr.bf16.mxu0 %v245_v3 }
  0x20   :  { %214 = vmatpush3.bf16.msra.mxu0 %v213_v25 }
  0x23   :  { %189 = vmatmul.mubr.f32.vlgmr.msra.gmra.mrb[0].mxu0 %v21_v26 }
  0xf6   :  { %v104_v28 = vpop.f32.mrb[0].mxu0 }
  0xf7   :  { %v121_v29 = vadd.f32 %v138_v27, %v104_v28  ;;  %v190_v30 = vpop.f32.mrb[1].mxu0 }
  0xf9   :  { %219 = vtanh.f32 %v121_v29 }
 0x103   :  { %v220_v31 = vpop.eup %219 }
 0x104   :  { %123 = vst [vmem:[#allocation3] sm:$0xff] %v220_v31 }
 0x105   :  { %232 = shalt.err (!%p229_p4)
}
 0x106   :  { %s233_s2 = scalar_lea.hbm %s338_s3, 128 }
 0x107   :  { %p234_p5 = scmp.ne.s32.totalorder %s338_s3, %s233_s2  ;;  %p237_p6 = scmp.lt.u32.totalorder %s233_s2, %s338_s3 }
 0x109   :  { %p239_p7 = pnand %p237_p6, %p234_p5 }
 0x10b   :  { %242 = shalt.err (!%p239_p7)
}
 0x10c   :  { %133 = dma.vmem_to_hbm [thread:$0]  %s131_s22, 128, %s338_s3, [#allocation4]  }
 0x10d   :  { %243 = dma.done.wait [#allocation4], 128  }
 0x10e   :  { %244 = vsyncadd [#allocation4], 4294967168 }
 0x10f   :  { %137 = vsyncpa [#allocation4], 1 }

</bundles_post_ra>
